<compile_context>
chip_gen: v6e
topology: v6e:2x2x1
jax: 0.10.0
libtpu: 0.0.40
codegen_flags: <defaults>
</compile_context>

<pallas_src>
import numpy as np
import jax
import jax.numpy as jnp
from jax import lax
from jax.experimental import pallas as pl
from jax.experimental.pallas import tpu as pltpu


def make_upsample_filter(filter_1d=(1.0, 3.0, 3.0, 1.0),
                         function="upsample", upsample_factor=1, pad=None):
    """Replicates UpsampleFunc.__init__ filter/pad setup deterministically."""
    f = np.asarray(filter_1d, dtype=np.float32)
    assert f.ndim == 1, "separable (1-D) filter expected (module builds f x f)"
    f2d = f[None, :] * f[:, None]
    f2d = f2d / f2d.sum()
    if function == "upsample":
        f2d = f2d * 4.0
        pad = (2, 1)
    if function != "upsample" and upsample_factor > 1:
        f2d = f2d * (upsample_factor ** 2)
    g = 2.0 * f / f.sum()   # 1-D polyphase taps: f2d == g (outer) g on this path
    return f2d, g, pad


def _horizontal_matrix(g, w):
    """(W, 2W) band matrix: horizontal polyphase filter + column interleave.

    (v @ A)[2j]   = g[1]*v[j] + g[3]*v[j-1]
    (v @ A)[2j+1] = g[2]*v[j] + g[0]*v[j+1]
    """
    a = np.zeros((w, 2 * w), np.float32)
    for j in range(w):
        for t, k in enumerate((2 * j - 1, 2 * j, 2 * j + 1, 2 * j + 2)):
            if 0 <= k < 2 * w:
                a[j, k] = g[t]
    return a


def _packed_matrix(g, w, kp):
    """(kp*W, kp*4W) matrix folding horizontal filter + column interleave +
    within-pack vertical taps + even/odd output-row interleave.

    Input lane block q holds input row m = p*kp + q; output lane block q holds
    [even output row 2m | odd output row 2m+1] (each 2W wide)."""
    a1 = _horizontal_matrix(g, w)
    g0, g1, g2, g3 = (float(v) for v in g)
    w2 = 2 * w
    a = np.zeros((kp * w, kp * 4 * w), np.float32)
    for q in range(kp):
        r0 = q * w
        e = q * 4 * w          # even slot of block q
        o = e + w2             # odd slot of block q
        a[r0:r0 + w, e:e + w2] += g1 * a1                      # out_even[m]   += g1*hcol[m]
        a[r0:r0 + w, o:o + w2] += g2 * a1                      # out_odd[m]    += g2*hcol[m]
        if q + 1 < kp:
            a[r0:r0 + w, e + 4 * w:e + 4 * w + w2] += g3 * a1  # out_even[m+1] += g3*hcol[m]
        if q >= 1:
            a[r0:r0 + w, o - 4 * w:o - 4 * w + w2] += g0 * a1  # out_odd[m-1]  += g0*hcol[m]
    return a


def _pick_row_pack(h, w):
    """kp consecutive rows packed along lanes: smallest divisor of H reaching
    128 lanes (without exceeding 512); else the largest divisor <= 512 lanes."""
    divs = [d for d in range(1, h + 1) if h % d == 0]
    good = [d for d in divs if 128 <= d * w <= 512]
    if good:
        return min(good)
    ok = [d for d in divs if d * w <= 512]
    return max(ok) if ok else 1


def _pick_images_per_block(n_images, hp, in_lanes, out_lanes, itemsize):
    """Whole images per block; rows % 8 == 0 (or the full array); block data
    (double-buffered in+out plus the f32 accumulator value) within budget;
    prefer >= 4 grid steps (>= 2 per v7x core), then >= 2."""
    budget = 16 * 1024 * 1024

    def lane_pad(l):
        return ((l + 127) // 128) * 128

    def est(b):
        rows = b * hp
        rpad = ((rows + 7) // 8) * 8
        io = rpad * (lane_pad(in_lanes) + lane_pad(out_lanes)) * itemsize
        acc = rpad * lane_pad(out_lanes) * 4          # f32 accumulator value
        return 2 * io + acc

    valid = [b for b in range(1, n_images + 1)
             if n_images % b == 0 and ((b * hp) % 8 == 0 or b == n_images)]
    fitting = [b for b in valid if est(b) <= budget]
    if not fitting:
        # TODO(synk): H-tiling with a 1-row halo for images too large for VMEM.
        return min(valid)
    for min_steps in (4, 2, 1):
        cand = [b for b in fitting if n_images // b >= min_steps]
        if cand:
            return max(cand)
    return max(fitting)


def _make_kernel(g, kp, w, hp, out_dtype):
    g0, g1, g2, g3 = (float(v) for v in g)
    w2 = 2 * w
    out_lanes = kp * 4 * w

    def kernel(x_ref, afull_ref, aband_ref, o_ref):
        # x_ref : (R, kp*W)      kp input rows of one image packed per lane row
        # afull : (kp*W, kp*4W)  fused filter / interleave matrix
        # aband : (W, 2W)        horizontal band matrix for the boundary rows
        # o_ref : (R, kp*4W)     final output, lanes already in row-major order
        x = x_ref[...]
        r = x.shape[0]

        # Everything except the two cross-pack vertical taps: one MXU matmul.
        out = jnp.dot(x, afull_ref[...], preferred_element_type=jnp.float32)
        o_ref[...] = out.astype(out_dtype)

        if hp > 1:
            # Cross-pack vertical neighbours: the first (last) input row of each
            # packed row needs the last (first) row of the previous (next) packed
            # row.  Sublane rolls (XLU) + tiny boundary matmuls, masked at image
            # edges (input rows -1 and H are zero padding in upfirdn2d).
            x_up = pltpu.roll(x, 1, axis=0)[:, (kp - 1) * w:]   # row above, last block
            x_dn = pltpu.roll(x, r - 1, axis=0)[:, :w]          # row below, first block
            up = jnp.dot(x_up, aband_ref[...],
                         preferred_element_type=jnp.float32) * g3
            dn = jnp.dot(x_dn, aband_ref[...],
                         preferred_element_type=jnp.float32) * g0

            p = lax.broadcasted_iota(jnp.int32, (r, 1), 0) % hp  # narrow row phase
            up = jnp.where(p == 0, 0.0, up)
            dn = jnp.where(p == hp - 1, 0.0, dn)

            o_ref[:, :w2] = (out[:, :w2] + up).astype(out_dtype)
            o_ref[:, out_lanes - w2:] = (out[:, out_lanes - w2:] + dn).astype(out_dtype)

    return kernel


def upsample_func_forward(x, g, pad=(2, 1)):
    """Forward pass of UpsampleFunc(function='upsample'): NCHW -> NCHW (2x)."""
    assert tuple(pad) == (2, 1) and len(g) == 4, "only the up=2 path is implemented"
    n, c, h, w = x.shape
    nc = n * c

    kp = _pick_row_pack(h, w)
    hp = h // kp
    in_lanes = kp * w
    out_lanes = kp * 4 * w
    dtype = x.dtype
    param_dtype = jnp.bfloat16 if dtype == jnp.bfloat16 else jnp.float32

    g_np = np.asarray(g, np.float32)
    a_full = jnp.asarray(_packed_matrix(g_np, w, kp), dtype=param_dtype)
    a_band = jnp.asarray(_horizontal_matrix(g_np, w), dtype=param_dtype)

    xf = x.reshape(nc * hp, in_lanes)              # free (row-major) reshape

    b = _pick_images_per_block(nc, hp, in_lanes, out_lanes, dtype.itemsize)
    rows = b * hp
    grid = (nc // b,)

    kernel = _make_kernel(g_np, kp, w, hp, dtype)

    out = pl.pallas_call(
        kernel,
        out_shape=jax.ShapeDtypeStruct((nc * hp, out_lanes), dtype),
        grid=grid,
        in_specs=[
            pl.BlockSpec((rows, in_lanes), lambda i: (i, 0)),
            pl.BlockSpec((in_lanes, out_lanes), lambda i: (0, 0)),
            pl.BlockSpec((w, 2 * w), lambda i: (0, 0)),
        ],
        out_specs=pl.BlockSpec((rows, out_lanes), lambda i: (i, 0)),
        compiler_params=pltpu.CompilerParams(
            dimension_semantics=("parallel",),
            vmem_limit_bytes=48 * 1024 * 1024),
    )(xf, a_full, a_band)

    # (nc*H/kp, kp*4W): lanes are already [even row 2m | odd row 2m+1] per input
    # row m in row-major order => free reshape to NCHW, no trailing cast.
    return out.reshape(n, c, 2 * h, 2 * w)


def _reference_upsample(x, filt_np, pad=(2, 1)):
    """Pure-JAX reference via dilated conv (matches upfirdn2d_native)."""
    n, c, h, w = x.shape
    nc = n * c
    xf = x.reshape(nc, 1, h, w).astype(jnp.float32)
    wflip = jnp.asarray(np.ascontiguousarray(filt_np[::-1, ::-1]))[None, None, :, :]
    out = lax.conv_general_dilated(
        xf, wflip, window_strides=(1, 1),
        padding=((pad[0], pad[1] + 1), (pad[0], pad[1] + 1)),
        lhs_dilation=(2, 2),
        dimension_numbers=("NCHW", "OIHW", "NCHW"),
        precision=lax.Precision.HIGHEST)
    return out.reshape(n, c, out.shape[-2], out.shape[-1])


if __name__ == "__main__":
    # Deterministic filter/pad setup, as in UpsampleFunc([1,3,3,1], pad=(2,1)).
    filt2d, g, pad = make_upsample_filter((1.0, 3.0, 3.0, 1.0),
                                          function="upsample")

    key = jax.random.PRNGKey(0)
    x = jax.random.normal(key, (2, 4, 16, 16), dtype=jnp.float32)  # NCHW

    out = jax.block_until_ready(upsample_func_forward(x, g, pad))
    ref = jax.block_until_ready(_reference_upsample(x, filt2d, pad))

    assert out.shape == (2, 4, 32, 32), out.shape
    np.testing.assert_allclose(np.asarray(out), np.asarray(ref, dtype=np.float32),
                               rtol=1e-4, atol=1e-4)

    print("KERNEL_OK")
</pallas_src>

<mosaic_0001>
module attributes {stable_mosaic.version = 11 : i64} {
  func.func @kernel(%arg0: i32, %arg1: memref<8x128xf32, #tpu.memory_space<vmem>>, %arg2: memref<128x512xf32, #tpu.memory_space<vmem>>, %arg3: memref<16x32xf32, #tpu.memory_space<vmem>>, %arg4: memref<8x512xf32, #tpu.memory_space<vmem>>) attributes {dimension_semantics = [#tpu.dimension_semantics<parallel>], iteration_bounds = array<i64: 2>, scalar_prefetch = 0 : i64, scratch_operands = 0 : i64, tpu.core_type = #tpu.core_type<tc>, window_params = [{transform_indices = @transform_0, window_bounds = array<i64: 8, 128>}, {pipeline_mode = #tpu.pipeline_mode<synchronous>, transform_indices = @transform_1, window_bounds = array<i64: 128, 512>}, {pipeline_mode = #tpu.pipeline_mode<synchronous>, transform_indices = @transform_2, window_bounds = array<i64: 16, 32>}, {transform_indices = @transform_3, window_bounds = array<i64: 8, 512>}]} {
    %c0 = arith.constant 0 : index
    %c0_0 = arith.constant 0 : index
    %0 = vector.load %arg1[%c0, %c0_0] : memref<8x128xf32, #tpu.memory_space<vmem>>, vector<8x128xf32>
    %c0_1 = arith.constant 0 : index
    %c0_2 = arith.constant 0 : index
    %1 = vector.load %arg2[%c0_1, %c0_2] : memref<128x512xf32, #tpu.memory_space<vmem>>, vector<128x512xf32>
    %cst = arith.constant dense<0.000000e+00> : vector<8x512xf32>
    %2 = tpu.matmul %0, %1, %cst {dimension_numbers = #tpu.dot_dimension_numbers<[1], [0], [0], [1], [0, 0, 1, 1], [], []>} : vector<8x128xf32>, vector<128x512xf32>, vector<8x512xf32> -> vector<8x512xf32>
    %c0_3 = arith.constant 0 : index
    %c0_4 = arith.constant 0 : index
    %3 = vector.load %arg4[%c0_3, %c0_4] : memref<8x512xf32, #tpu.memory_space<vmem>>, vector<8x512xf32>
    tpu.vector_store %arg4[%c0_3, %c0_4], %2 {strides = array<i32>} : memref<8x512xf32, #tpu.memory_space<vmem>>, vector<8x512xf32>,
    %c1_i32 = arith.constant 1 : i32
    %4 = tpu.dynamic_rotate %0 by %c1_i32 dim 0 : vector<8x128xf32>, i32 -> vector<8x128xf32>
    %5 = vector.extract_strided_slice %4 {offsets = [0, 112], sizes = [8, 16], strides = [1, 1]} : vector<8x128xf32> to vector<8x16xf32>
    %c7_i32 = arith.constant 7 : i32
    %6 = tpu.dynamic_rotate %0 by %c7_i32 dim 0 : vector<8x128xf32>, i32 -> vector<8x128xf32>
    %7 = vector.extract_strided_slice %6 {offsets = [0, 0], sizes = [8, 16], strides = [1, 1]} : vector<8x128xf32> to vector<8x16xf32>
    %c0_5 = arith.constant 0 : index
    %c0_6 = arith.constant 0 : index
    %8 = vector.load %arg3[%c0_5, %c0_6] : memref<16x32xf32, #tpu.memory_space<vmem>>, vector<16x32xf32>
    %cst_7 = arith.constant dense<0.000000e+00> : vector<8x32xf32>
    %9 = tpu.matmul %5, %8, %cst_7 {dimension_numbers = #tpu.dot_dimension_numbers<[1], [0], [0], [1], [0, 0, 1, 1], [], []>} : vector<8x16xf32>, vector<16x32xf32>, vector<8x32xf32> -> vector<8x32xf32>
    %cst_8 = arith.constant 2.500000e-01 : f32
    %10 = vector.broadcast %cst_8 : f32 to vector<8x32xf32>
    %11 = arith.mulf %9, %10 : vector<8x32xf32>
    %c0_9 = arith.constant 0 : index
    %c0_10 = arith.constant 0 : index
    %12 = vector.load %arg3[%c0_9, %c0_10] : memref<16x32xf32, #tpu.memory_space<vmem>>, vector<16x32xf32>
    %cst_11 = arith.constant dense<0.000000e+00> : vector<8x32xf32>
    %13 = tpu.matmul %7, %12, %cst_11 {dimension_numbers = #tpu.dot_dimension_numbers<[1], [0], [0], [1], [0, 0, 1, 1], [], []>} : vector<8x16xf32>, vector<16x32xf32>, vector<8x32xf32> -> vector<8x32xf32>
    %cst_12 = arith.constant 2.500000e-01 : f32
    %14 = vector.broadcast %cst_12 : f32 to vector<8x32xf32>
    %15 = arith.mulf %13, %14 : vector<8x32xf32>
    %16 = tpu.iota {dimensions = array<i32: 0>} : vector<8x1xi32>
    %c2_i32 = arith.constant 2 : i32
    %c0_i32 = arith.constant 0 : i32
    %17 = arith.cmpi eq, %c2_i32, %c0_i32 : i32
    %c1_i32_13 = arith.constant 1 : i32
    %18 = arith.select %17, %c1_i32_13, %c2_i32 : i32
    %19 = vector.broadcast %18 : i32 to vector<8x1xi32>
    %20 = arith.remsi %16, %19 : vector<8x1xi32>
    %c0_i32_14 = arith.constant 0 : i32
    %21 = vector.broadcast %c0_i32_14 : i32 to vector<8x1xi32>
    %22 = arith.cmpi ne, %20, %21 : vector<8x1xi32>
    %c0_i32_15 = arith.constant 0 : i32
    %23 = vector.broadcast %c0_i32_15 : i32 to vector<8x1xi32>
    %24 = arith.cmpi slt, %20, %23 : vector<8x1xi32>
    %c0_i32_16 = arith.constant 0 : i32
    %25 = arith.cmpi slt, %18, %c0_i32_16 : i32
    %26 = vector.broadcast %25 : i1 to vector<8x1xi1>
    %27 = vector.broadcast %26 : vector<8x1xi1> to vector<8x1xi1>
    %28 = arith.xori %24, %27 : vector<8x1xi1>
    %29 = arith.andi %28, %22 : vector<8x1xi1>
    %30 = vector.broadcast %18 : i32 to vector<8x1xi32>
    %31 = arith.addi %20, %30 : vector<8x1xi32>
    %32 = arith.select %29, %31, %20 : vector<8x1xi1>, vector<8x1xi32>
    %c0_i32_17 = arith.constant 0 : i32
    %33 = vector.broadcast %c0_i32_17 : i32 to vector<8x1xi32>
    %34 = arith.cmpi eq, %32, %33 : vector<8x1xi32>
    %cst_18 = arith.constant 0.000000e+00 : f32
    %35 = vector.shape_cast %34 : vector<8x1xi1> to vector<8x1xi1>
    %36 = vector.broadcast %35 : vector<8x1xi1> to vector<8x32xi1>
    %37 = vector.broadcast %cst_18 : f32 to vector<8x32xf32>
    %38 = arith.select %36, %37, %11 : vector<8x32xi1>, vector<8x32xf32>
    %c1_i32_19 = arith.constant 1 : i32
    %39 = vector.broadcast %c1_i32_19 : i32 to vector<8x1xi32>
    %40 = arith.cmpi eq, %32, %39 : vector<8x1xi32>
    %cst_20 = arith.constant 0.000000e+00 : f32
    %41 = vector.shape_cast %40 : vector<8x1xi1> to vector<8x1xi1>
    %42 = vector.broadcast %41 : vector<8x1xi1> to vector<8x32xi1>
    %43 = vector.broadcast %cst_20 : f32 to vector<8x32xf32>
    %44 = arith.select %42, %43, %15 : vector<8x32xi1>, vector<8x32xf32>
    %45 = vector.extract_strided_slice %2 {offsets = [0, 0], sizes = [8, 32], strides = [1, 1]} : vector<8x512xf32> to vector<8x32xf32>
    %46 = arith.addf %45, %38 : vector<8x32xf32>
    %c0_21 = arith.constant 0 : index
    %c0_22 = arith.constant 0 : index
    %47 = vector.load %arg4[%c0_21, %c0_22] : memref<8x512xf32, #tpu.memory_space<vmem>>, vector<8x32xf32>
    tpu.vector_store %arg4[%c0_21, %c0_22], %46 {strides = array<i32>} : memref<8x512xf32, #tpu.memory_space<vmem>>, vector<8x32xf32>,
    %48 = vector.extract_strided_slice %2 {offsets = [0, 480], sizes = [8, 32], strides = [1, 1]} : vector<8x512xf32> to vector<8x32xf32>
    %49 = arith.addf %48, %44 : vector<8x32xf32>
    %c0_23 = arith.constant 0 : index
    %c480 = arith.constant 480 : index
    %50 = vector.load %arg4[%c0_23, %c480] : memref<8x512xf32, #tpu.memory_space<vmem>>, vector<8x32xf32>
    tpu.vector_store %arg4[%c0_23, %c480], %49 {strides = array<i32>} : memref<8x512xf32, #tpu.memory_space<vmem>>, vector<8x32xf32>,
    return
  }
  func.func @transform_0(%arg0: i32) -> (i32, i32) {
    %c0_i32 = arith.constant 0 : i32
    %c0_i32_0 = arith.constant 0 : i32
    return %arg0, %c0_i32 : i32, i32
  }
  func.func @transform_1(%arg0: i32) -> (i32, i32) {
    %c0_i32 = arith.constant 0 : i32
    %c0_i32_0 = arith.constant 0 : i32
    %c0_i32_1 = arith.constant 0 : i32
    return %c0_i32, %c0_i32_0 : i32, i32
  }
  func.func @transform_2(%arg0: i32) -> (i32, i32) {
    %c0_i32 = arith.constant 0 : i32
    %c0_i32_0 = arith.constant 0 : i32
    %c0_i32_1 = arith.constant 0 : i32
    return %c0_i32, %c0_i32_0 : i32, i32
  }
  func.func @transform_3(%arg0: i32) -> (i32, i32) {
    %c0_i32 = arith.constant 0 : i32
    %c0_i32_0 = arith.constant 0 : i32
    return %arg0, %c0_i32 : i32, i32
  }
}

</mosaic_0001>

<bundles_post_ra>
// kernel: tpu_custom_call.1
= control target key start
LH: loop header
LB: loop body
LE: loop exit
PB: predicated region body
PF: predicated region fallthrough
CT: control target
= control target key end

     0   :  { %8 = vsyncpa [#allocation3], 0  ;;  %s1210_s0 = inlined_call_operand.hbm [shape: f32[16,128], index: 0, kind: input, shape index: {}]   ;;  %s1211_s1 = inlined_call_operand.hbm [shape: f32[128,512], index: 1, kind: input, shape index: {}]   ;;  %s1212_s2 = inlined_call_operand.hbm [shape: f32[16,32], index: 2, kind: input, shape index: {}]   ;;  %s1213_s3 = inlined_call_operand.hbm [shape: f32[16,512], index: 3, kind: output, shape index: {}]  }
   0x1   :  { %10 = vsyncpa [#allocation3 + $0x1], 0 }
   0x2   :  { %11 = vsyncpa [#allocation6], 0 }
   0x3   :  { %12 = vsyncpa [#allocation4], 0 }
   0x4   :  { %14 = vsyncpa [#allocation4 + $0x1], 0  ;;  %s1014_s12 = smov 0   ;;  %s1016_s13 = smov 0  }
   0x5   :  { %s1018_s14 = smov 0   ;;  %s1020_s15 = smov 0  }
   0x6 LB: > { %s1035_s16 = sadd.s32 4294967295, %s980_s15   ;;  %s717_s17 = sadd.s32 4294967294, %s980_s15   ;;  %s980_s15 = sphi %s1020_s15, %s1235_s15   ;;  %s976_s14 = sphi %s1018_s14, %s1234_s14   ;;  %s972_s13 = sphi %s1016_s13, %s1233_s13   ;;  %s968_s12 = sphi %s1014_s12, %s1232_s12  }
   0x7   : > { %p40_p0 = scmp.ne.s32.totalorder %s972_s13, %s968_s12  ;;  %p1214_p1 = scmp.eq.s32.totalorder %s1035_s16, 0 }
   0x8   : > { %p112_p3 = scmp.eq.s32.totalorder %s717_s17, 1  ;;  %p718_p5 = scmp.ge.s32.totalorder %s980_s15, 1 }
   0x9   : > { %p1044_p4 = por %p1214_p1, %p40_p0  ;;  %p119_p7 = scmp.lt.s32.totalorder %s980_s15, 3 }
   0xa   : > { %p1049_p6 = por %p112_p3, %p40_p0  ;;  %s982_s21 = smov [#allocation5]  }
   0xb   : > { %s1218_s18 = scalar_select %p1044_p4, 1, 0 }
   0xc   : > { %s1219_s19 = scalar_select %p1049_p6, 1, 0 }
   0xd   : > { %p1054_p8 = pnand %p718_p5, %p119_p7  ;;  %s131_s22 = sshll.u32 %s982_s21, 4  ;;  %s132_s22 = int_to_ptr.vmem [resolvable:$true] %s131_s22 }
   0xe   : > { %s983_s24 = smov [#allocation7]   ;;  %s843_s26 = scalar_lea.vmem %s132_s22, 8192 }
   0xf   : > { %s1220_s20 = scalar_select %p1054_p8, 1, 0 }
  0x10   : > { %p769_p9 = pneg %p1054_p8  ;;  %s144_s25 = sshll.u32 %s983_s24, 4  ;;  %s145_s25 = int_to_ptr.vmem [resolvable:$true] %s144_s25 }
  0x11   : > { %p844_p13 = scmp.ne.s32.totalorder %s132_s22, %s843_s26  ;;  %p851_p5 = scmp.lt.s32.totalorder %s132_s22, %s132_s22 }
  0x12   : > { %p1063_p11 = pnand %p769_p9, %p1214_p1  ;;  %p852_p7 = scmp.lt.s32.totalorder %s843_s26, %s843_s26 }
  0x14   : > { %p834_p12 = pneg %p1063_p11  ;;  %p853_p10 = por %p852_p7, %p851_p5 }
  0x16   : > { %p846_p0 = pnand %p844_p13, %p834_p12 }
  0x18   : > { %p847_p3 = pneg %p846_p0 }
  0x1a   : > { %p854_p9 = pnand %p853_p10, %p847_p3 }
  0x1c   : > { %857 = shalt.err (!%p854_p9)
}
  0x1d   : > { %s984_s27 = smov 512   ;;  %s985_s28 = smov 32  }
  0x1e   : > { %772 = dma.hbm_to_vmem [thread:$0]  (!%p1063_p11), %s1211_s1, 8192, %s132_s22, [#allocation6], %s984_s27, %s984_s27, %s985_s28  }
  0x1f   : > { %s869_s4 = scalar_lea.vmem %s145_s25, 256  ;;  %p877_p2 = scmp.lt.s32.totalorder %s145_s25, %s145_s25 }
  0x20   : > { %p870_p1 = scmp.ne.s32.totalorder %s145_s25, %s869_s4  ;;  %p878_p6 = scmp.lt.s32.totalorder %s869_s4, %s869_s4 }
  0x22   : > { %p872_p13 = pnand %p870_p1, %p834_p12  ;;  %p879_p5 = por %p878_p6, %p877_p2 }
  0x24   : > { %p873_p0 = pneg %p872_p13 }
  0x26   : > { %p880_p10 = pnand %p879_p5, %p873_p0 }
  0x28   : > { %883 = shalt.err (!%p880_p10)
}
  0x29   : > { %s986_s5 = smov 128   ;;  %s987_s6 = smov 8  }
  0x2a   : > { %775 = dma.hbm_to_vmem [thread:$0]  (!%p1063_p11), %s1212_s2, 256, %s145_s25, [#allocation6], %s986_s5, %s986_s5, %s987_s6  }
  0x2b   : > { %s1086_s9 = sadd.s32 1, %s980_s15   ;;  %s27_s11 = sadd.s32 1, %s976_s14 }
  0x2c   : > { %s24_s10 = ssub.s32 %s980_s15, %s1086_s9  ;;  %p34_p2 = scmp.ne.s32.totalorder %s976_s14, %s972_s13 }
  0x2d   : > { %p25_p1 = scmp.eq.s32.totalorder %s24_s10, 0  ;;  %p35_p6 = scmp.eq.s32.totalorder %s980_s15, 0 }
  0x2e   : > { %p1222_p3 = scmp.eq.s32.totalorder %s1035_s16, 1  ;;  %p786_p9 = scmp.lt.s32.totalorder %s980_s15, 2 }
  0x2f   : > { %s1095_s17 = scalar_select %p25_p1, %s976_s14, %s27_s11  }
  0x30   : > { %p36_p12 = por %p35_p6, %p34_p2  ;;  %p1099_p7 = por %p1222_p3, %p34_p2 }
  0x31   : > { %s158_s22 = sand.u32 1, %s976_s14   ;;  %s723_s24 = sshll.u32 %s980_s15, 7 }
  0x32   : > { %s1223_s21 = scalar_select %p1099_p7, 1, 0 }
  0x33   : > { %s722_s23 = sshll.u32 %s158_s22, 3  ;;  %s1109_s27 = scalar_lea.hbm %s1210_s0, %s723_s24 }
  0x34   : > { %s162_s28 = scalar_lea.vmem [#allocation2], %s722_s23  ;;  %p1111_p11 = pnand %p786_p9, %p36_p12 }
  0x35   : > { %s169_s29 = sshll.u32 %s162_s28, 4  ;;  %s159_s4 = scalar_lea.sflag [#allocation3], %s158_s22  ;;  %s170_s29 = int_to_ptr.vmem [resolvable:$true] %s169_s29 }
  0x36   : > { %s884_s5 = scalar_lea.hbm %s1109_s27, 128  ;;  %p886_p0 = pneg %p1111_p11 }
  0x37   : > { %p885_p13 = scmp.ne.s32.totalorder %s1109_s27, %s884_s5  ;;  %s889_s8 = scalar_lea.hbm %s1210_s0, 256 }
  0x38   : > { %p890_p1 = scmp.lt.s32.totalorder %s1109_s27, %s1210_s0  ;;  %p891_p2 = scmp.lt.s32.totalorder %s889_s8, %s884_s5 }
  0x39   : > { %p887_p5 = pnand %p886_p0, %p885_p13 }
  0x3a   : > { %p892_p6 = por %p891_p2, %p890_p1 }
  0x3b   : > { %p888_p10 = pneg %p887_p5 }
  0x3d   : > { %p893_p12 = pnand %p892_p6, %p888_p10 }
  0x3f   : > { %896 = shalt.err (!%p893_p12)
}
  0x40   : > { %s897_s23 = scalar_lea.vmem %s170_s29, 128  ;;  %s988_s22 = smov [#allocation2]  }
  0x41   : > { %p898_p3 = scmp.ne.s32.totalorder %s170_s29, %s897_s23  ;;  %s902_s24 = sshll.u32 %s988_s22, 4  ;;  %s903_s24 = int_to_ptr.vmem [resolvable:$false] %s902_s24 }
  0x42   : > { %s904_s25 = scalar_lea.vmem %s903_s24, 256  ;;  %p905_p13 = scmp.lt.s32.totalorder %s170_s29, %s903_s24 }
  0x43   : > { %p900_p9 = pnand %p898_p3, %p886_p0  ;;  %p906_p5 = scmp.lt.s32.totalorder %s904_s25, %s897_s23 }
  0x45   : > { %p901_p7 = pneg %p900_p9  ;;  %p907_p4 = por %p906_p5, %p905_p13 }
  0x47   : > { %p908_p8 = pnand %p907_p4, %p901_p7 }
  0x49   : > { %911 = shalt.err (!%p908_p8)
}
  0x4a   : > { %779 = dma.hbm_to_vmem [thread:$0]  (!%p1111_p11), %s1109_s27, 128, %s170_s29, %s159_s4  }
  0x4b   : > { %p1225_p10 = scmp.ne.s32.totalorder %s1220_s20, 0 }
  0x4c   : > { %s1132_s26 = sand.u32 (!%p1225_p10), 1, %s972_s13   ;;  %p1226_p0 = scmp.ne.s32.totalorder (!%p1225_p10), %s1218_s18, 0 }
  0x4d   : > { %178 = sbr.rel (%p1225_p10) target bundleno = 450 (0x1c2), region = 32  ;;  %s725_s28 = sshll.u32 (!%p1225_p10), %s1132_s26, 3 }
  0x4e   : > { %s181_s5 = scalar_lea.sflag (!%p1225_p10), [#allocation3], %s1132_s26  ;;  %s1136_s6 = scalar_lea.vmem (!%p1225_p10), [#allocation2], %s725_s28 }
  0x52   : > { %955 = dma.done.wait (%p1226_p0), %s181_s5, 128  }
  0x53   : > { %957 = vsyncadd (%p1226_p0), %s181_s5, 4294967168  ;;  %p1227_p4 = scmp.eq.s32.totalorder %s1035_s16, 0 }
  0x55   : > { %959 = dma.done.wait (%p1227_p4), [#allocation6], 8448   ;;  %p1228_p8 = pmov %p1227_p4 }
  0x56   : > { %v989_v0 = vmov 0.0   ;;  %v279_v1 = vld [vmem:[#allocation5 + $0x1f8] sm:$0xff]  ;;  %v278_v2 = vld [vmem:[#allocation5 + $0x1f0] sm:$0xff]  ;;  %v277_v17 = vld [vmem:[#allocation5 + $0x1e8] sm:$0xff]  ;;  %s990_s18 = smov 16   ;;  %vm991_vm0 = vmmov 0  }
  0x57   : > { %961 = vsyncadd (%p1228_p8), [#allocation6], 4294958848  ;;  %415 = vmatprep.mubr.f32.mxu1 %v989_v0  ;;  %344 = vmatprep.mubr.f32.mxu0 %v989_v0  ;;  %v275_v3 = vld [vmem:[#allocation5 + $0x1d8] sm:$0xff]  ;;  %v274_v4 = vld [vmem:[#allocation5 + $0x1d0] sm:$0xff]  ;;  %vm433_vm1 = vcmask 130048   ;;  %s728_s20 = sshll.u32 %s1132_s26, 5 }
  0x58   : > { %351 = vmatprep.subr.mxu1 %v279_v1  ;;  %v271_v5 = vld [vmem:[#allocation5 + $0x1b8] sm:$0xff]  ;;  %v270_v6 = vld [vmem:[#allocation5 + $0x1b0] sm:$0xff]  ;;  %280 = vmatprep.subr.mxu0 %v277_v17  ;;  %v276_v19 = vld [vmem:[#allocation5 + $0x1e0] sm:$0xff]  ;;  %s1166_s27 = scalar_lea.vmem [#allocation8], %s728_s20  ;;  %s992_s29 = smov 96   ;;  %vm604_vm4 = vcmask 261120  }
  0x59   : > { %352 = vmatpush1.msra.mxu1 %v278_v2  ;;  %v267_v7 = vld [vmem:[#allocation5 + $0x198] sm:$0xff]  ;;  %v266_v8 = vld [vmem:[#allocation5 + $0x190] sm:$0xff]  ;;  %v273_v20 = vld [vmem:[#allocation5 + $0x1c8] sm:$0xff]  ;;  %281 = vmatpush1.msra.mxu0 %v276_v19  ;;  %s736_s30 = sshll.u32 %s1035_s16, 9  ;;  %s628_s4 = sshll.u32 %s1166_s27, 4  ;;  %vm611_vm5 = vcmask 1048320   ;;  %s629_s4 = int_to_ptr.vmem [resolvable:$true] %s628_s4 }
  0x5a   : > { %353 = vmatprep.subr.mxu1 %v275_v3  ;;  %v263_v9 = vld [vmem:[#allocation5 + $0x178] sm:$0xff]  ;;  %v262_v10 = vld [vmem:[#allocation5 + $0x170] sm:$0xff]  ;;  %v272_v22 = vld [vmem:[#allocation5 + $0x1c0] sm:$0xff]  ;;  %282 = vmatprep.subr.mxu0 %v273_v20  ;;  %s626_s10 = scalar_lea.hbm %s1213_s3, %s736_s30  ;;  %s614_s11 = scalar_lea.sflag [#allocation4], %s1132_s26 }
  0x5b   : > { %354 = vmatpush1.msra.mxu1 %v274_v4  ;;  %v259_v11 = vld [vmem:[#allocation5 + $0x158] sm:$0xff]  ;;  %v258_v12 = vld [vmem:[#allocation5 + $0x150] sm:$0xff]  ;;  %v269_v24 = vld [vmem:[#allocation5 + $0x1a8] sm:$0xff]  ;;  %283 = vmatpush1.msra.mxu0 %v272_v22  ;;  %s912_s23 = scalar_lea.vmem %s629_s4, 512  ;;  %p1229_p11 = scmp.ne.s32.totalorder %s1223_s21, 0 }
  0x5c   : > { %355 = vmatprep.subr.mxu1 %v271_v5  ;;  %v255_v13 = vld [vmem:[#allocation5 + $0x138] sm:$0xff]  ;;  %v254_v15 = vld [vmem:[#allocation5 + $0x130] sm:$0xff]  ;;  %v268_v26 = vld [vmem:[#allocation5 + $0x1a0] sm:$0xff]  ;;  %284 = vmatprep.subr.mxu0 %v269_v24  ;;  %p913_p7 = scmp.ne.s32.totalorder %s629_s4, %s912_s23  ;;  %s993_s22 = smov [#allocation8]  }
  0x5d   : > { %356 = vmatpush1.msra.mxu1 %v270_v6  ;;  %v1149_v14 = vld [vmem:[%s1136_s6] sm:$0xff]  ;;  %v265_v28 = vld [vmem:[#allocation5 + $0x188] sm:$0xff]  ;;  %v264_v30 = vld [vmem:[#allocation5 + $0x180] sm:$0xff]  ;;  %285 = vmatpush1.msra.mxu0 %v268_v26  ;;  %s916_s24 = sshll.u32 %s993_s22, 4  ;;  %s917_s24 = int_to_ptr.vmem [resolvable:$false] %s916_s24 }
  0x5e   : > { %357 = vmatprep.subr.mxu1 %v267_v7  ;;  %v426_v16 = vrot.slane %v1149_v14, 7  ;;  %v251_v18 = vld [vmem:[#allocation5 + $0x118] sm:$0xff]  ;;  %v250_v21 = vld [vmem:[#allocation5 + $0x110] sm:$0xff]  ;;  %v261_v32 = vld [vmem:[#allocation5 + $0x168] sm:$0xff]  ;;  %286 = vmatprep.subr.mxu0 %v265_v28  ;;  %v427_v57 = vrot.slane %v1149_v14, 1  ;;  %p914_p1 = pnand %p913_p7, %p1229_p11  ;;  %s918_s16 = scalar_lea.vmem %s917_s24, 1024 }
  0x5f   : > { %358 = vmatpush1.msra.mxu1 %v266_v8  ;;  %v247_v23 = vld [vmem:[#allocation5 + $0xf8] sm:$0xff]  ;;  %v246_v25 = vld [vmem:[#allocation5 + $0xf0] sm:$0xff]  ;;  %v260_v34 = vld [vmem:[#allocation5 + $0x160] sm:$0xff]  ;;  %287 = vmatpush1.msra.mxu0 %v264_v30  ;;  %v581_v8 = vlaneseq  ;;  %p919_p6 = scmp.lt.s32.totalorder %s629_s4, %s917_s24  ;;  %p920_p12 = scmp.lt.s32.totalorder %s918_s16, %s912_s23 }
  0x60   : > { %359 = vmatprep.subr.mxu1 %v263_v9  ;;  %431 = vrot.lane.b32.xlu0 %v426_v16, %s990_s18  ;;  %v243_v27 = vld [vmem:[#allocation5 + $0xd8] sm:$0xff]  ;;  %v242_v29 = vld [vmem:[#allocation5 + $0xd0] sm:$0xff]  ;;  %v257_v36 = vld [vmem:[#allocation5 + $0x148] sm:$0xff]  ;;  %p915_p2 = pneg %p914_p1 }
  0x61   : > { %360 = vmatpush1.msra.mxu1 %v262_v10  ;;  %v239_v31 = vld [vmem:[#allocation5 + $0xb8] sm:$0xff]  ;;  %v238_v33 = vld [vmem:[#allocation5 + $0xb0] sm:$0xff]  ;;  %288 = vmatprep.subr.mxu0 %v261_v32  ;;  %v256_v38 = vld [vmem:[#allocation5 + $0x140] sm:$0xff]  ;;  %v582_v9 = vshrl.u32 %v581_v8, 7  ;;  %p921_p3 = por %p920_p12, %p919_p6 }
  0x62   : > { %361 = vmatprep.subr.mxu1 %v259_v11  ;;  %v235_v35 = vld [vmem:[#allocation5 + $0x98] sm:$0xff]  ;;  %v234_v37 = vld [vmem:[#allocation5 + $0x90] sm:$0xff]  ;;  %289 = vmatpush1.msra.mxu0 %v260_v34  ;;  %v253_v40 = vld [vmem:[#allocation5 + $0x128] sm:$0xff] }
  0x63   : > { %362 = vmatpush1.msra.mxu1 %v258_v12  ;;  %v231_v39 = vld [vmem:[#allocation5 + $0x78] sm:$0xff]  ;;  %v230_v41 = vld [vmem:[#allocation5 + $0x70] sm:$0xff]  ;;  %290 = vmatprep.subr.mxu0 %v257_v36  ;;  %v252_v42 = vld [vmem:[#allocation5 + $0x120] sm:$0xff]  ;;  %v587_v11 = vand.u32 1, %v582_v9  ;;  %p922_p9 = pnand %p921_p3, %p915_p2 }
  0x64   : > { %363 = vmatprep.subr.mxu1 %v255_v13  ;;  %v227_v43 = vld [vmem:[#allocation5 + $0x58] sm:$0xff]  ;;  %291 = vmatpush1.msra.mxu0 %v256_v38  ;;  %v249_v44 = vld [vmem:[#allocation5 + $0x108] sm:$0xff]  ;;  %v226_v45 = vld [vmem:[#allocation5 + $0x50] sm:$0xff] }
  0x65   : > { %364 = vmatpush1.msra.mxu1 %v254_v15  ;;  %292 = vmatprep.subr.mxu0 %v253_v40  ;;  %v248_v46 = vld [vmem:[#allocation5 + $0x100] sm:$0xff]  ;;  %v223_v47 = vld [vmem:[#allocation5 + $0x38] sm:$0xff]  ;;  %v245_v48 = vld [vmem:[#allocation5 + $0xe8] sm:$0xff]  ;;  %vm599_vm2 = vcmp.eq.s32.totalorder %v587_v11, 1  ;;  %vm595_vm3 = vcmp.eq.s32.totalorder %v587_v11, 0 }
  0x66   : > { %365 = vmatprep.subr.mxu1 %v251_v18  ;;  %293 = vmatpush1.msra.mxu0 %v252_v42  ;;  %v222_v49 = vld [vmem:[#allocation5 + $0x30] sm:$0xff]  ;;  %v244_v50 = vld [vmem:[#allocation5 + $0xe0] sm:$0xff]  ;;  %v219_v51 = vld [vmem:[#allocation5 + $0x18] sm:$0xff] }
  0x67   : > { %366 = vmatpush1.msra.mxu1 %v250_v21  ;;  %294 = vmatprep.subr.mxu0 %v249_v44  ;;  %v241_v52 = vld [vmem:[#allocation5 + $0xc8] sm:$0xff]  ;;  %v218_v53 = vld [vmem:[#allocation5 + $0x10] sm:$0xff]  ;;  %v240_v54 = vld [vmem:[#allocation5 + $0xc0] sm:$0xff] }
  0x68   : > { %367 = vmatprep.subr.mxu1 %v247_v23  ;;  %295 = vmatpush1.msra.mxu0 %v248_v46  ;;  %v429_v55 = vld [vmem:[#allocation7 + $0x8] sm:$0xff]  ;;  %v428_v58 = vld [vmem:[#allocation7] sm:$0xff] }
  0x69   : > { %368 = vmatpush1.msra.mxu1 %v246_v25  ;;  %296 = vmatprep.subr.mxu0 %v245_v48  ;;  %v237_v56 = vld [vmem:[#allocation5 + $0xa8] sm:$0xff]  ;;  %v236_v59 = vld [vmem:[#allocation5 + $0xa0] sm:$0xff] }
  0x6a   : > { %369 = vmatprep.subr.mxu1 %v243_v27  ;;  %297 = vmatpush1.msra.mxu0 %v244_v50  ;;  %v233_v60 = vld [vmem:[#allocation5 + $0x88] sm:$0xff]  ;;  %v232_v61 = vld [vmem:[#allocation5 + $0x80] sm:$0xff] }
  0x6b   : > { %370 = vmatpush1.msra.mxu1 %v242_v29  ;;  %298 = vmatprep.subr.mxu0 %v241_v52  ;;  %v229_v62 = vld [vmem:[#allocation5 + $0x68] sm:$0xff]  ;;  %v228_v63 = vld [vmem:[#allocation5 + $0x60] sm:$0xff] }
  0x6c   : > { %371 = vmatprep.subr.mxu1 %v239_v31  ;;  %299 = vmatpush1.msra.mxu0 %v240_v54  ;;  %v225_v1 = vld [vmem:[#allocation5 + $0x48] sm:$0xff]  ;;  %v224_v2 = vld [vmem:[#allocation5 + $0x40] sm:$0xff] }
  0x6d   : > { %372 = vmatpush1.msra.mxu1 %v238_v33  ;;  %300 = vmatprep.subr.mxu0 %v237_v56  ;;  %v221_v3 = vld [vmem:[#allocation5 + $0x28] sm:$0xff]  ;;  %v220_v4 = vld [vmem:[#allocation5 + $0x20] sm:$0xff] }
  0x6e   : > { %373 = vmatprep.subr.mxu1 %v235_v35  ;;  %301 = vmatpush1.msra.mxu0 %v236_v59  ;;  %v217_v5 = vld [vmem:[#allocation5 + $0x8] sm:$0xff]  ;;  %v216_v6 = vld [vmem:[#allocation5] sm:$0xff] }
  0x6f   : > { %374 = vmatpush1.msra.mxu1 %v234_v37  ;;  %302 = vmatprep.subr.mxu0 %v233_v60 }
  0x70   : > { %375 = vmatprep.subr.mxu1 %v231_v39  ;;  %303 = vmatpush1.msra.mxu0 %v232_v61 }
  0x71   : > { %376 = vmatpush1.msra.mxu1 %v230_v41  ;;  %304 = vmatprep.subr.mxu0 %v229_v62 }
  0x72   : > { %377 = vmatprep.subr.mxu1 %v227_v43  ;;  %305 = vmatpush1.msra.mxu0 %v228_v63 }
  0x73   : > { %378 = vmatpush1.msra.mxu1 %v226_v45  ;;  %306 = vmatprep.subr.mxu0 %v225_v1 }
  0x74   : > { %379 = vmatprep.subr.mxu1 %v223_v47  ;;  %307 = vmatpush1.msra.mxu0 %v224_v2 }
  0x75   : > { %380 = vmatpush1.msra.mxu1 %v222_v49  ;;  %308 = vmatprep.subr.mxu0 %v221_v3 }
  0x76   : > { %381 = vmatprep.subr.mxu1 %v219_v51  ;;  %309 = vmatpush1.msra.mxu0 %v220_v4 }
  0x77   : > { %382 = vmatpush1.msra.mxu1 %v218_v53  ;;  %310 = vmatprep.subr.mxu0 %v217_v5 }
  0x78   : > { %416 = vmatmul.mubr.f32.vlgmr.msra.gmra.mxu1 %v1149_v14  ;;  %750 = vmatprep.subr.mxu1 %v989_v0 }
  0x79   : > { %751 = vmatpush3.msra.mxu1 %v429_v55  ;;  %754 = vmatprep.mubr.msk.f32.mxu1 %vm991_vm0, %v989_v0 }
  0x7a   : > { %752 = vmatprep.subr.mxu1 %v989_v0  ;;  %311 = vmatpush1.msra.mxu0 %v216_v6 }
  0x7b   : > { %753 = vmatpush3.msra.mxu1 %v428_v58  ;;  %345 = vmatmul.mubr.f32.vlgmr.msra.gmra.mxu0 %v1149_v14 }
  0x7c   : > { %755 = vmatmul.mubr.msk.f32.vlgmr.msra.gmra.mxu1 %vm433_vm1, %v427_v57  ;;  %743 = vmatprep.subr.mxu0 %v989_v0 }
  0x7d   : > { %744 = vmatpush3.msra.mxu0 %v429_v55  ;;  %747 = vmatprep.mubr.msk.f32.mxu0 %vm991_vm0, %v989_v0 }
  0x7e   : > { %745 = vmatprep.subr.mxu0 %v989_v0 }
  0x7f   : > { %746 = vmatpush3.msra.mxu0 %v428_v58 }
  0xd2   : > { %v432_v7 = vpop.permute.xlu0 %431 }
  0xd3   : > { %748 = vmatmul.mubr.msk.f32.vlgmr.msra.gmra.mxu0 %vm433_vm1, %v432_v7 }
 0x138   : > { %v417_v10 = vpop.f32.mrf.mxu1 }
 0x139   : > { %424 = vst [vmem:[%s1166_s27 + $0x10] sm:$0xff] %v417_v10 }
 0x13a   : > { %v419_v12 = vpop.f32.mrf.mxu1 }
 0x13b   : > { %425 = vst [vmem:[%s1166_s27 + $0x18] sm:$0xff] %v419_v12  ;;  %v346_v16 = vpop.f32.mrf.mxu0 }
 0x13c   : > { %v576_v13 = vpop.f32.mrf.mxu1  ;;  %422 = vst [vmem:[%s1166_s27] sm:$0xff] %v346_v16 }
 0x13d   : > { %v580_v0 = vmul.f32 0.25, %v576_v13  ;;  %v348_v17 = vpop.f32.mrf.mxu0 }
 0x13e   : > { %v756_v14 = vpop.f32.mrf.mxu1  ;;  %423 = vst [vmem:[%s1166_s27 + $0x8] sm:$0xff] %v348_v17 }
 0x13f   : > { %v602_v15 = vsel %vm599_vm2, 0.0, %v580_v0 }
 0x140   : > { %607 = vrot.lane.b32.xlu0 %v602_v15, %s992_s29 }
 0x193   : > { %v502_v18 = vpop.f32.mrf.mxu0 }
 0x194   : > { %v506_v19 = vmul.f32 0.25, %v502_v18 }
 0x195   : > { %v749_v20 = vpop.f32.mrf.mxu0 }
 0x196   : > { %v598_v21 = vsel %vm595_vm3, 0.0, %v506_v19 }
 0x197   : > { %v603_v22 = vadd.f32 %v598_v21, %v346_v16 }
 0x199   : > { %605 = vst.msk [vmem:[%s1166_s27] sm:$0xff] %vm604_vm4, %v603_v22 }
 0x1b2   : > { %v608_v23 = vpop.permute.xlu0 %607 }
 0x1b3   : > { %v610_v24 = vadd.f32 %v608_v23, %v419_v12 }
 0x1b5   : > { %612 = vst.msk [vmem:[%s1166_s27 + $0x18] sm:$0xff] %vm611_vm5, %v610_v24 }
 0x1b6   : > { %925 = shalt.err (!%p922_p9)
}
 0x1b7   : > { %s926_s25 = scalar_lea.hbm %s626_s10, 512  ;;  %s930_s5 = scalar_lea.hbm %s1213_s3, 1024 }
 0x1b8   : > { %p927_p13 = scmp.ne.s32.totalorder %s626_s10, %s926_s25  ;;  %p931_p0 = scmp.lt.s32.totalorder %s626_s10, %s1213_s3 }
 0x1b9   : > { %p932_p4 = scmp.lt.s32.totalorder %s930_s5, %s926_s25 }
 0x1ba   : > { %p928_p5 = pnand %p927_p13, %p1229_p11 }
 0x1bb   : > { %p933_p8 = por %p932_p4, %p931_p0 }
 0x1bc   : > { %p929_p10 = pneg %p928_p5 }
 0x1be   : > { %p934_p7 = pnand %p933_p8, %p929_p10 }
 0x1c0   : > { %937 = shalt.err (!%p934_p7)
}
 0x1c1   : > { %767 = dma.vmem_to_hbm [thread:$0]  (%p1229_p11), %s629_s4, 512, %s626_s10, %s614_s11  }
 0x1c2 PF: > { %s640_s20 = sand.u32 1, %s968_s12   ;;  %p1230_p1 = scmp.ne.s32.totalorder %s1219_s19, 0 }
 0x1c3   : > { %p1231_p2 = scmp.ge.s32.totalorder %s980_s15, 2  ;;  %s641_s27 = scalar_lea.sflag [#allocation4], %s640_s20 }
 0x1c5   : > { %p781_p6 = pnand %p1231_p2, %p1230_p1 }
 0x1c7   : > { %p782_p12 = pneg %p781_p6 }
 0x1c9   : > { %963 = dma.done.wait (%p782_p12), %s641_s27, 512  }
 0x1ca   : > { %965 = vsyncadd (%p782_p12), %s641_s27, 4294966784  ;;  %p17_p3 = scmp.ge.s32.totalorder %s1086_s9, 4   ;;  %s1232_s12 = smov %s972_s13 }
 0x1cb   : > { %s1233_s13 = smov %s976_s14  ;;  %s1234_s14 = smov %s1095_s17 }
 0x1cc   : > { %s1235_s15 = smov %s1086_s9  ;;  %19 = sbr.rel (!%p17_p3) target bundleno = 6 (0x6), region = 85 }
 0x1d1   :  { %646 = vsyncpa [#allocation3], 1 }
 0x1d2   :  { %648 = vsyncpa [#allocation3 + $0x1], 1 }
 0x1d3   :  { %649 = vsyncpa [#allocation6], 1 }
 0x1d4   :  { %650 = vsyncpa [#allocation4], 1 }
 0x1d5   :  { %652 = vsyncpa [#allocation4 + $0x1], 1 }

</bundles_post_ra>
